<compile_context>
chip_gen: v7x
topology: tpu7x:2x2x1
jax: 0.10.0
libtpu: 0.0.40
codegen_flags: <defaults>
</compile_context>

<pallas_src>
import numpy as np
import jax
import jax.numpy as jnp
from jax.experimental import pallas as pl
from jax.experimental.pallas import tpu as pltpu

N_QUBITS = 4
N_LAYERS = 2
DIM = 2 ** N_QUBITS  # 16


# ----------------------------------------------------------------------------
# Pallas kernel (feature-major: activations are (features, batch_tile))
# ----------------------------------------------------------------------------
def hybrid_kernel(x_ref, w1_ref, b1_ref, vq_ref, w3_ref, o_ref):
    x = x_ref[...]                                             # (IN, TB)

    # feature_projector: angles = W1 @ x + b1   -> (4, TB)
    angles = jnp.dot(w1_ref[...], x,
                     preferred_element_type=jnp.float32) + b1_ref[...]

    c = jnp.cos(0.5 * angles)                                  # (4, TB)
    s = jnp.sin(0.5 * angles)                                  # (4, TB)

    # Product-state magnitudes after RX encoding (wire 0 = MSB):
    #   mag[b, :] = prod_i (s_i if bit_i(b)==1 else c_i)
    # One hardware select (vsel) per qubit instead of the arithmetic blend.
    row = jax.lax.broadcasted_iota(jnp.int32, (DIM, 1), 0)     # (16, 1)
    mag = None
    for i in range(N_QUBITS):                                  # static 4-iter loop
        bit = jnp.bitwise_and(
            jnp.right_shift(row, N_QUBITS - 1 - i), 1) == 1    # (16, 1) bool
        factor = jnp.where(bit, s[i:i + 1, :], c[i:i + 1, :])  # (16, TB)
        mag = factor if mag is None else mag * factor

    # vq rows  0:32 = [Re(U diag p); Im(U diag p)]   (phase fold, host-side)
    # vq rows 32:96 = W2 @ Z^T + b2 @ 1^T            (readout + b2 fold; sum(probs)=1)
    # Row offsets 0 / 32 are sublane-tile aligned -> these stay views.
    v = vq_ref[:2 * DIM, :]                                    # (32, 16)
    zw = vq_ref[2 * DIM:, :]                                   # (64, 16)

    psi = jnp.dot(v, mag, preferred_element_type=jnp.float32)  # (32, TB)
    psi_r = psi[:DIM, :]
    psi_i = psi[DIM:, :]
    probs = psi_r * psi_r + psi_i * psi_i                      # (16, TB)

    # post_net: Linear(4,64) with <Z>, b2 folded in -> ReLU -> Linear(64,1)
    h = jnp.maximum(
        jnp.dot(zw, probs, preferred_element_type=jnp.float32), 0.0)   # (64, TB)

    out = jnp.dot(w3_ref[...], h, preferred_element_type=jnp.float32)  # (1, TB)
    o_ref[...] = out.astype(o_ref.dtype)


# ----------------------------------------------------------------------------
# Host-side glue: parameter init, fixed-circuit unitary, folded tables
# ----------------------------------------------------------------------------
def _kron_list(ops):
    out = ops[0]
    for o in ops[1:]:
        out = np.kron(out, o)
    return out


_I2 = np.eye(2, dtype=np.complex128)
_X = np.array([[0, 1], [1, 0]], dtype=np.complex128)
_P0 = np.array([[1, 0], [0, 0]], dtype=np.complex128)
_P1 = np.array([[0, 0], [0, 1]], dtype=np.complex128)


def _rx(t):
    return np.array([[np.cos(t / 2), -1j * np.sin(t / 2)],
                     [-1j * np.sin(t / 2), np.cos(t / 2)]], dtype=np.complex128)


def _ry(t):
    return np.array([[np.cos(t / 2), -np.sin(t / 2)],
                     [np.sin(t / 2), np.cos(t / 2)]], dtype=np.complex128)


def _rz(t):
    return np.array([[np.exp(-1j * t / 2), 0],
                     [0, np.exp(1j * t / 2)]], dtype=np.complex128)


def _embed_1q(g, wire):
    ops = [_I2] * N_QUBITS
    ops[wire] = g
    return _kron_list(ops)


def _embed_cnot(c, t):
    ops0 = [_I2] * N_QUBITS
    ops0[c] = _P0
    ops1 = [_I2] * N_QUBITS
    ops1[c] = _P1
    ops1[t] = _X
    return _kron_list(ops0) + _kron_list(ops1)


def build_fixed_unitary(qweights):
    """16x16 unitary for the weight-dependent (input-independent) circuit part.
    PennyLane convention: wire 0 is the most significant bit of the index."""
    U = np.eye(DIM, dtype=np.complex128)
    for layer in range(N_LAYERS):
        for i in range(N_QUBITS):
            U = _embed_1q(_rz(qweights[layer, i, 0]), i) @ U
            U = _embed_1q(_ry(qweights[layer, i, 1]), i) @ U
            U = _embed_1q(_rz(qweights[layer, i, 2]), i) @ U
        for i in range(N_QUBITS - 1):
            U = _embed_cnot(i, i + 1) @ U
    return U


def build_folded_params(W1, b1, qweights, W2, b2, W3, b3):
    """Fold the encoding phase, <Z> readout and b2 into the weight tables."""
    U = build_fixed_unitary(np.asarray(qweights, np.float64))
    b = np.arange(DIM)
    bits = np.stack([(b >> (N_QUBITS - 1 - i)) & 1 for i in range(N_QUBITS)],
                    axis=1).astype(np.float64)                       # (16, 4)
    k = bits.sum(axis=1).astype(np.int64) % 4
    p = np.array([1.0, -1j, -1.0, 1j], np.complex128)[k]             # (-i)^popcount
    Uc = U @ np.diag(p)                                              # phase folded
    V = np.concatenate([Uc.real, Uc.imag], axis=0)                   # (32, 16)
    zmat_t = (1.0 - 2.0 * bits).T                                    # (4, 16)
    ZW = np.asarray(W2, np.float64) @ zmat_t                         # (64, 16)
    # Exact b2 fold: probs = |psi|^2 of a unit-norm state, so sum(probs) == 1
    # and (ZW + b2 1^T) @ probs == ZW @ probs + b2.
    ZWb = ZW + np.asarray(b2, np.float64)[:, None]
    vq = np.concatenate([V, ZWb], axis=0).astype(np.float32)         # (96, 16)

    w1 = np.asarray(W1, np.float32)                                  # (4, IN)
    b1c = np.asarray(b1, np.float32)[:, None]                        # (4, 1)
    w3 = np.asarray(W3, np.float32)                                  # (1, 64)
    b3c = np.asarray(b3, np.float32).reshape(1, 1)                   # (1, 1)
    return w1, b1c, vq, w3, b3c


def init_params(key, input_size):
    ks = jax.random.split(key, 7)
    # nn.Linear-style uniform(-1/sqrt(fan_in), 1/sqrt(fan_in)) init
    lim1 = 1.0 / np.sqrt(input_size)
    W1 = jax.random.uniform(ks[0], (N_QUBITS, input_size), jnp.float32, -lim1, lim1)
    b1 = jax.random.uniform(ks[1], (N_QUBITS,), jnp.float32, -lim1, lim1)
    qw = 0.01 * jax.random.normal(ks[2], (N_LAYERS, N_QUBITS, 3), jnp.float32)
    lim2 = 1.0 / np.sqrt(N_QUBITS)
    W2 = jax.random.uniform(ks[3], (64, N_QUBITS), jnp.float32, -lim2, lim2)
    b2 = jax.random.uniform(ks[4], (64,), jnp.float32, -lim2, lim2)
    lim3 = 1.0 / np.sqrt(64)
    W3 = jax.random.uniform(ks[5], (1, 64), jnp.float32, -lim3, lim3)
    b3 = jax.random.uniform(ks[6], (1,), jnp.float32, -lim3, lim3)
    return W1, b1, qw, W2, b2, W3, b3


def _round_up(n, m):
    return ((n + m - 1) // m) * m


def _choose_tb(batch, *, max_tb=8192, target_blocks=4):
    """Batch tile (lanes): multiple of 128, clamped to [min(512,B128), max_tb],
    sized so the grid has >= target_blocks steps when the batch allows it
    (so v7x's two TensorCores each get >= 2 steps)."""
    b128 = _round_up(max(int(batch), 1), 128)
    tb = _round_up(pl.cdiv(b128, target_blocks), 128)
    lo = min(512, b128)
    return int(max(lo, min(tb, max_tb)))


def make_hybrid_forward(W1, b1, qweights, W2, b2, W3, b3, *, max_tb=8192):
    """Fold weights once, upload once, return a jitted forward over x."""
    w1_np, b1_np, vq_np, w3_np, b3_np = build_folded_params(
        W1, b1, qweights, W2, b2, W3, b3)
    w1 = jnp.asarray(w1_np)
    b1c = jnp.asarray(b1_np)
    vq = jnp.asarray(vq_np)
    w3 = jnp.asarray(w3_np)
    b3c = jnp.asarray(b3_np)

    @jax.jit
    def forward(x):
        x = jnp.asarray(x, jnp.float32)
        B, IN = x.shape
        TB = _choose_tb(B, max_tb=max_tb)
        Bp = _round_up(B, TB)

        # Feature-major layout: (features, batch) with batch on the 128-wide
        # lane axis.  Under jit the transpose + pad fuse into one prep copy.
        xt = jnp.pad(x.T, ((0, 0), (0, Bp - B)))               # (IN, Bp)

        out = pl.pallas_call(
            hybrid_kernel,
            out_shape=jax.ShapeDtypeStruct((1, Bp), jnp.float32),
            grid=(Bp // TB,),
            in_specs=[
                pl.BlockSpec((IN, TB), lambda i: (0, i)),          # x (pipelined)
                pl.BlockSpec((N_QUBITS, IN), lambda i: (0, 0)),    # W1
                pl.BlockSpec((N_QUBITS, 1), lambda i: (0, 0)),     # b1
                pl.BlockSpec((6 * DIM, DIM), lambda i: (0, 0)),    # [V ; ZW + b2]
                pl.BlockSpec((1, 64), lambda i: (0, 0)),           # W3
            ],
            out_specs=pl.BlockSpec((1, TB), lambda i: (0, i)),
            compiler_params=pltpu.CompilerParams(
                dimension_semantics=("parallel",)),
        )(xt, w1, b1c, vq, w3)

        # b3 add + unpad + transpose fuse into one tiny epilogue op under jit.
        return out[:, :B].T + b3c                               # (B, 1)

    return forward


def hybrid_forward(x, W1, b1, qweights, W2, b2, W3, b3, *, max_tb=8192):
    # One-off convenience wrapper; prefer make_hybrid_forward to reuse the
    # folded tables across calls.
    return make_hybrid_forward(W1, b1, qweights, W2, b2, W3, b3,
                               max_tb=max_tb)(x)


# ----------------------------------------------------------------------------
# Pure numpy reference (independent sequential statevector simulation)
# ----------------------------------------------------------------------------
def _apply_1q(state, g, wire):
    state = np.tensordot(g, state, axes=([1], [wire]))
    return np.moveaxis(state, 0, wire)


def _apply_cnot(state, c, t):
    s = state.copy()
    idx = [slice(None)] * N_QUBITS
    idx[c] = 1
    s[tuple(idx)] = np.flip(state[tuple(idx)], axis=t - 1 if t > c else t)
    return s


def reference_forward(x, W1, b1, qw, W2, b2, W3, b3):
    angles = x @ W1.T + b1
    B = x.shape[0]
    q_out = np.zeros((B, N_QUBITS), dtype=np.float64)
    bits = np.stack([(np.arange(DIM) >> (N_QUBITS - 1 - i)) & 1
                     for i in range(N_QUBITS)], axis=1)       # (16, 4)
    for bi in range(B):
        st = np.zeros((2,) * N_QUBITS, dtype=np.complex128)
        st[(0,) * N_QUBITS] = 1.0
        for i in range(N_QUBITS):
            st = _apply_1q(st, _rx(angles[bi, i]), i)
        for layer in range(N_LAYERS):
            for i in range(N_QUBITS):
                st = _apply_1q(st, _rz(qw[layer, i, 0]), i)
                st = _apply_1q(st, _ry(qw[layer, i, 1]), i)
                st = _apply_1q(st, _rz(qw[layer, i, 2]), i)
            for i in range(N_QUBITS - 1):
                st = _apply_cnot(st, i, i + 1)
        probs = np.abs(st.reshape(-1)) ** 2
        q_out[bi] = probs @ (1.0 - 2.0 * bits)
    h = np.maximum(q_out @ W2.T + b2, 0.0)
    return h @ W3.T + b3


if __name__ == "__main__":
    batch = 8
    input_size = 16

    key = jax.random.PRNGKey(0)
    kx, kp = jax.random.split(key)
    x = jax.random.normal(kx, (batch, input_size), jnp.float32)
    W1, b1, qw, W2, b2, W3, b3 = init_params(kp, input_size)

    fwd = make_hybrid_forward(W1, b1, qw, W2, b2, W3, b3)   # fold + upload once
    out = jax.block_until_ready(fwd(x))

    ref = reference_forward(
        np.asarray(x, np.float64), np.asarray(W1, np.float64),
        np.asarray(b1, np.float64), np.asarray(qw, np.float64),
        np.asarray(W2, np.float64), np.asarray(b2, np.float64),
        np.asarray(W3, np.float64), np.asarray(b3, np.float64))

    assert out.shape == (batch, 1)
    assert np.allclose(np.asarray(out), ref, atol=1e-3, rtol=1e-3), (
        np.max(np.abs(np.asarray(out) - ref)))
    print("KERNEL_OK")
</pallas_src>

<mosaic_0001>
module attributes {stable_mosaic.version = 11 : i64} {
  func.func @hybrid_kernel(%arg0: i32, %arg1: memref<16x128xf32, #tpu.memory_space<vmem>>, %arg2: memref<4x16xf32, #tpu.memory_space<vmem>>, %arg3: memref<4x1xf32, #tpu.memory_space<vmem>>, %arg4: memref<96x16xf32, #tpu.memory_space<vmem>>, %arg5: memref<1x64xf32, #tpu.memory_space<vmem>>, %arg6: memref<1x128xf32, #tpu.memory_space<vmem>>) attributes {dimension_semantics = [#tpu.dimension_semantics<parallel>], iteration_bounds = array<i64: 1>, scalar_prefetch = 0 : i64, scratch_operands = 0 : i64, tpu.core_type = #tpu.core_type<tc>, window_params = [{transform_indices = @transform_0, window_bounds = array<i64: 16, 128>}, {pipeline_mode = #tpu.pipeline_mode<synchronous>, transform_indices = @transform_1, window_bounds = array<i64: 4, 16>}, {pipeline_mode = #tpu.pipeline_mode<synchronous>, transform_indices = @transform_2, window_bounds = array<i64: 4, 1>}, {pipeline_mode = #tpu.pipeline_mode<synchronous>, transform_indices = @transform_3, window_bounds = array<i64: 96, 16>}, {pipeline_mode = #tpu.pipeline_mode<synchronous>, transform_indices = @transform_4, window_bounds = array<i64: 1, 64>}, {transform_indices = @transform_5, window_bounds = array<i64: 1, 128>}]} {
    %c0 = arith.constant 0 : index
    %c0_0 = arith.constant 0 : index
    %0 = vector.load %arg1[%c0, %c0_0] : memref<16x128xf32, #tpu.memory_space<vmem>>, vector<16x128xf32>
    %c0_1 = arith.constant 0 : index
    %c0_2 = arith.constant 0 : index
    %1 = vector.load %arg2[%c0_1, %c0_2] : memref<4x16xf32, #tpu.memory_space<vmem>>, vector<4x16xf32>
    %cst = arith.constant dense<0.000000e+00> : vector<4x128xf32>
    %2 = tpu.matmul %1, %0, %cst {dimension_numbers = #tpu.dot_dimension_numbers<[1], [0], [0], [1], [0, 0, 1, 1], [], []>} : vector<4x16xf32>, vector<16x128xf32>, vector<4x128xf32> -> vector<4x128xf32>
    %c0_3 = arith.constant 0 : index
    %c0_4 = arith.constant 0 : index
    %3 = vector.load %arg3[%c0_3, %c0_4] : memref<4x1xf32, #tpu.memory_space<vmem>>, vector<4x1xf32>
    %4 = vector.broadcast %3 : vector<4x1xf32> to vector<4x128xf32>
    %5 = arith.addf %2, %4 : vector<4x128xf32>
    %cst_5 = arith.constant 5.000000e-01 : f32
    %6 = vector.broadcast %cst_5 : f32 to vector<4x128xf32>
    %7 = arith.mulf %6, %5 : vector<4x128xf32>
    %8 = math.cos %7 : vector<4x128xf32>
    %cst_6 = arith.constant 5.000000e-01 : f32
    %9 = vector.broadcast %cst_6 : f32 to vector<4x128xf32>
    %10 = arith.mulf %9, %5 : vector<4x128xf32>
    %11 = math.sin %10 : vector<4x128xf32>
    %12 = tpu.iota {dimensions = array<i32: 0>} : vector<16x1xi32>
    %c3_i32 = arith.constant 3 : i32
    %13 = vector.broadcast %c3_i32 : i32 to vector<16x1xi32>
    %14 = arith.shrsi %12, %13 : vector<16x1xi32>
    %c1_i32 = arith.constant 1 : i32
    %15 = vector.broadcast %c1_i32 : i32 to vector<16x1xi32>
    %16 = arith.andi %14, %15 : vector<16x1xi32>
    %c1_i32_7 = arith.constant 1 : i32
    %17 = vector.broadcast %c1_i32_7 : i32 to vector<16x1xi32>
    %18 = arith.cmpi eq, %16, %17 : vector<16x1xi32>
    %19 = vector.extract_strided_slice %11 {offsets = [0, 0], sizes = [1, 128], strides = [1, 1]} : vector<4x128xf32> to vector<1x128xf32>
    %20 = vector.extract_strided_slice %8 {offsets = [0, 0], sizes = [1, 128], strides = [1, 1]} : vector<4x128xf32> to vector<1x128xf32>
    %21 = vector.shape_cast %18 : vector<16x1xi1> to vector<16x1xi1>
    %22 = vector.broadcast %21 : vector<16x1xi1> to vector<16x128xi1>
    %23 = vector.shape_cast %19 : vector<1x128xf32> to vector<1x128xf32>
    %24 = vector.broadcast %23 : vector<1x128xf32> to vector<16x128xf32>
    %25 = vector.shape_cast %20 : vector<1x128xf32> to vector<1x128xf32>
    %26 = vector.broadcast %25 : vector<1x128xf32> to vector<16x128xf32>
    %27 = arith.select %22, %24, %26 : vector<16x128xi1>, vector<16x128xf32>
    %c2_i32 = arith.constant 2 : i32
    %28 = vector.broadcast %c2_i32 : i32 to vector<16x1xi32>
    %29 = arith.shrsi %12, %28 : vector<16x1xi32>
    %c1_i32_8 = arith.constant 1 : i32
    %30 = vector.broadcast %c1_i32_8 : i32 to vector<16x1xi32>
    %31 = arith.andi %29, %30 : vector<16x1xi32>
    %c1_i32_9 = arith.constant 1 : i32
    %32 = vector.broadcast %c1_i32_9 : i32 to vector<16x1xi32>
    %33 = arith.cmpi eq, %31, %32 : vector<16x1xi32>
    %34 = vector.extract_strided_slice %11 {offsets = [1, 0], sizes = [1, 128], strides = [1, 1]} : vector<4x128xf32> to vector<1x128xf32>
    %35 = vector.extract_strided_slice %8 {offsets = [1, 0], sizes = [1, 128], strides = [1, 1]} : vector<4x128xf32> to vector<1x128xf32>
    %36 = vector.shape_cast %33 : vector<16x1xi1> to vector<16x1xi1>
    %37 = vector.broadcast %36 : vector<16x1xi1> to vector<16x128xi1>
    %38 = vector.shape_cast %34 : vector<1x128xf32> to vector<1x128xf32>
    %39 = vector.broadcast %38 : vector<1x128xf32> to vector<16x128xf32>
    %40 = vector.shape_cast %35 : vector<1x128xf32> to vector<1x128xf32>
    %41 = vector.broadcast %40 : vector<1x128xf32> to vector<16x128xf32>
    %42 = arith.select %37, %39, %41 : vector<16x128xi1>, vector<16x128xf32>
    %43 = arith.mulf %27, %42 : vector<16x128xf32>
    %c1_i32_10 = arith.constant 1 : i32
    %44 = vector.broadcast %c1_i32_10 : i32 to vector<16x1xi32>
    %45 = arith.shrsi %12, %44 : vector<16x1xi32>
    %c1_i32_11 = arith.constant 1 : i32
    %46 = vector.broadcast %c1_i32_11 : i32 to vector<16x1xi32>
    %47 = arith.andi %45, %46 : vector<16x1xi32>
    %c1_i32_12 = arith.constant 1 : i32
    %48 = vector.broadcast %c1_i32_12 : i32 to vector<16x1xi32>
    %49 = arith.cmpi eq, %47, %48 : vector<16x1xi32>
    %50 = vector.extract_strided_slice %11 {offsets = [2, 0], sizes = [1, 128], strides = [1, 1]} : vector<4x128xf32> to vector<1x128xf32>
    %51 = vector.extract_strided_slice %8 {offsets = [2, 0], sizes = [1, 128], strides = [1, 1]} : vector<4x128xf32> to vector<1x128xf32>
    %52 = vector.shape_cast %49 : vector<16x1xi1> to vector<16x1xi1>
    %53 = vector.broadcast %52 : vector<16x1xi1> to vector<16x128xi1>
    %54 = vector.shape_cast %50 : vector<1x128xf32> to vector<1x128xf32>
    %55 = vector.broadcast %54 : vector<1x128xf32> to vector<16x128xf32>
    %56 = vector.shape_cast %51 : vector<1x128xf32> to vector<1x128xf32>
    %57 = vector.broadcast %56 : vector<1x128xf32> to vector<16x128xf32>
    %58 = arith.select %53, %55, %57 : vector<16x128xi1>, vector<16x128xf32>
    %59 = arith.mulf %43, %58 : vector<16x128xf32>
    %c0_i32 = arith.constant 0 : i32
    %60 = vector.broadcast %c0_i32 : i32 to vector<16x1xi32>
    %61 = arith.shrsi %12, %60 : vector<16x1xi32>
    %c1_i32_13 = arith.constant 1 : i32
    %62 = vector.broadcast %c1_i32_13 : i32 to vector<16x1xi32>
    %63 = arith.andi %61, %62 : vector<16x1xi32>
    %c1_i32_14 = arith.constant 1 : i32
    %64 = vector.broadcast %c1_i32_14 : i32 to vector<16x1xi32>
    %65 = arith.cmpi eq, %63, %64 : vector<16x1xi32>
    %66 = vector.extract_strided_slice %11 {offsets = [3, 0], sizes = [1, 128], strides = [1, 1]} : vector<4x128xf32> to vector<1x128xf32>
    %67 = vector.extract_strided_slice %8 {offsets = [3, 0], sizes = [1, 128], strides = [1, 1]} : vector<4x128xf32> to vector<1x128xf32>
    %68 = vector.shape_cast %65 : vector<16x1xi1> to vector<16x1xi1>
    %69 = vector.broadcast %68 : vector<16x1xi1> to vector<16x128xi1>
    %70 = vector.shape_cast %66 : vector<1x128xf32> to vector<1x128xf32>
    %71 = vector.broadcast %70 : vector<1x128xf32> to vector<16x128xf32>
    %72 = vector.shape_cast %67 : vector<1x128xf32> to vector<1x128xf32>
    %73 = vector.broadcast %72 : vector<1x128xf32> to vector<16x128xf32>
    %74 = arith.select %69, %71, %73 : vector<16x128xi1>, vector<16x128xf32>
    %75 = arith.mulf %59, %74 : vector<16x128xf32>
    %c0_15 = arith.constant 0 : index
    %c0_16 = arith.constant 0 : index
    %76 = vector.load %arg4[%c0_15, %c0_16] : memref<96x16xf32, #tpu.memory_space<vmem>>, vector<32x16xf32>
    %c32 = arith.constant 32 : index
    %c0_17 = arith.constant 0 : index
    %77 = vector.load %arg4[%c32, %c0_17] : memref<96x16xf32, #tpu.memory_space<vmem>>, vector<64x16xf32>
    %cst_18 = arith.constant dense<0.000000e+00> : vector<32x128xf32>
    %78 = tpu.matmul %76, %75, %cst_18 {dimension_numbers = #tpu.dot_dimension_numbers<[1], [0], [0], [1], [0, 0, 1, 1], [], []>} : vector<32x16xf32>, vector<16x128xf32>, vector<32x128xf32> -> vector<32x128xf32>
    %79 = vector.extract_strided_slice %78 {offsets = [0, 0], sizes = [16, 128], strides = [1, 1]} : vector<32x128xf32> to vector<16x128xf32>
    %80 = vector.extract_strided_slice %78 {offsets = [16, 0], sizes = [16, 128], strides = [1, 1]} : vector<32x128xf32> to vector<16x128xf32>
    %81 = arith.mulf %79, %79 : vector<16x128xf32>
    %82 = arith.mulf %80, %80 : vector<16x128xf32>
    %83 = arith.addf %81, %82 : vector<16x128xf32>
    %cst_19 = arith.constant dense<0.000000e+00> : vector<64x128xf32>
    %84 = tpu.matmul %77, %83, %cst_19 {dimension_numbers = #tpu.dot_dimension_numbers<[1], [0], [0], [1], [0, 0, 1, 1], [], []>} : vector<64x16xf32>, vector<16x128xf32>, vector<64x128xf32> -> vector<64x128xf32>
    %cst_20 = arith.constant 0.000000e+00 : f32
    %85 = vector.broadcast %cst_20 : f32 to vector<64x128xf32>
    %86 = arith.maximumf %84, %85 : vector<64x128xf32>
    %c0_21 = arith.constant 0 : index
    %c0_22 = arith.constant 0 : index
    %87 = vector.load %arg5[%c0_21, %c0_22] : memref<1x64xf32, #tpu.memory_space<vmem>>, vector<1x64xf32>
    %cst_23 = arith.constant dense<0.000000e+00> : vector<1x128xf32>
    %88 = tpu.matmul %87, %86, %cst_23 {dimension_numbers = #tpu.dot_dimension_numbers<[1], [0], [0], [1], [0, 0, 1, 1], [], []>} : vector<1x64xf32>, vector<64x128xf32>, vector<1x128xf32> -> vector<1x128xf32>
    %c0_24 = arith.constant 0 : index
    %c0_25 = arith.constant 0 : index
    %89 = vector.load %arg6[%c0_24, %c0_25] : memref<1x128xf32, #tpu.memory_space<vmem>>, vector<1x128xf32>
    tpu.vector_store %arg6[%c0_24, %c0_25], %88 {strides = array<i32>} : memref<1x128xf32, #tpu.memory_space<vmem>>, vector<1x128xf32>,
    return
  }
  func.func @transform_0(%arg0: i32) -> (i32, i32) {
    %c0_i32 = arith.constant 0 : i32
    %c0_i32_0 = arith.constant 0 : i32
    return %c0_i32, %arg0 : i32, i32
  }
  func.func @transform_1(%arg0: i32) -> (i32, i32) {
    %c0_i32 = arith.constant 0 : i32
    %c0_i32_0 = arith.constant 0 : i32
    %c0_i32_1 = arith.constant 0 : i32
    return %c0_i32, %c0_i32_0 : i32, i32
  }
  func.func @transform_2(%arg0: i32) -> (i32, i32) {
    %c0_i32 = arith.constant 0 : i32
    %c0_i32_0 = arith.constant 0 : i32
    %c0_i32_1 = arith.constant 0 : i32
    return %c0_i32, %c0_i32_0 : i32, i32
  }
  func.func @transform_3(%arg0: i32) -> (i32, i32) {
    %c0_i32 = arith.constant 0 : i32
    %c0_i32_0 = arith.constant 0 : i32
    %c0_i32_1 = arith.constant 0 : i32
    return %c0_i32, %c0_i32_0 : i32, i32
  }
  func.func @transform_4(%arg0: i32) -> (i32, i32) {
    %c0_i32 = arith.constant 0 : i32
    %c0_i32_0 = arith.constant 0 : i32
    %c0_i32_1 = arith.constant 0 : i32
    return %c0_i32, %c0_i32_0 : i32, i32
  }
  func.func @transform_5(%arg0: i32) -> (i32, i32) {
    %c0_i32 = arith.constant 0 : i32
    %c0_i32_0 = arith.constant 0 : i32
    return %c0_i32, %arg0 : i32, i32
  }
}

</mosaic_0001>

<bundles_post_ra>
// kernel: forward.1
= control target key start
LH: loop header
LB: loop body
LE: loop exit
PB: predicated region body
PF: predicated region fallthrough
CT: control target
= control target key end

     0   :  { %10 = vsyncpa [#allocation3], 0  ;;  %s916_s18 = smov [#allocation2]   ;;  %s1061_s0 = inlined_call_operand.vmem [shape: f32[16,128], index: 0, kind: input, shape index: {}]   ;;  %s1062_s1 = inlined_call_operand.vmem [shape: f32[4,16], index: 1, kind: input, shape index: {}]   ;;  %s1063_s2 = inlined_call_operand.vmem [shape: f32[4,1], index: 2, kind: input, shape index: {}]   ;;  %s1064_s3 = inlined_call_operand.hbm [shape: f32[96,16], index: 3, kind: input, shape index: {}]   ;;  %s1065_s4 = inlined_call_operand.vmem [shape: f32[1,64], index: 4, kind: input, shape index: {}]   ;;  %s1066_s5 = inlined_call_operand.vmem [shape: f32[1,128], index: 5, kind: output, shape index: {}]  }
   0x1   :  { %s22_s19 = sshll.u32 %s916_s18, 4  ;;  %s892_s22 = scalar_lea.hbm %s1064_s3, 1536  ;;  %s23_s19 = int_to_ptr.vmem [resolvable:$true] %s22_s19 }
   0x2   :  { %p893_p0 = scmp.ne.s32.totalorder %s1064_s3, %s892_s22  ;;  %p896_p1 = scmp.lt.u32.totalorder %s892_s22, %s1064_s3 }
   0x4   :  { %p898_p2 = pnand %p896_p1, %p893_p0 }
   0x6   :  { %901 = shalt.err (!%p898_p2)
}
   0x7   :  { %s902_s27 = scalar_lea.vmem %s23_s19, 1536  ;;  %p907_p4 = scmp.lt.s32.totalorder %s23_s19, %s23_s19 }
   0x8   :  { %p903_p3 = scmp.ne.s32.totalorder %s23_s19, %s902_s27  ;;  %p908_p5 = scmp.lt.s32.totalorder %s902_s27, %s902_s27 }
   0xa   :  { %p909_p6 = por %p908_p5, %p907_p4 }
   0xc   :  { %p910_p7 = pnand %p909_p6, %p903_p3 }
   0xe   :  { %913 = shalt.err (!%p910_p7)
}
   0xf   :  { %s917_s28 = smov 128   ;;  %s918_s29 = smov 8  }
  0x10   :  { %28 = dma.hbm_to_vmem [thread:$0]  %s1064_s3, 1536, %s23_s19, [#allocation3], %s917_s28, %s917_s28, %s918_s29  }
  0x11   :  { %914 = dma.done.wait [#allocation3], 1536  }
  0x12   :  { %915 = vsyncadd [#allocation3], 4294965760  ;;  %v919_v0 = vmov 0.0|0.0   ;;  %vm1067_vm0 = vmmov 0   ;;  %v921_v1 = vmov 0.0   ;;  %v922_v2 = vmov 0  }
  0x13   :  { %847 = vmatprep.subr.bf16.mxu0 %v919_v0  ;;  %799 = vmatprep.mubr.msk.f32.mxu0 %vm1067_vm0, %v921_v1  ;;  %v34_v3 = vld [vmem:[%s1061_s0] sm:$0xff]  ;;  %v35_v4 = vld [vmem:[%s1061_s0 + $0x8] sm:$0xff]  ;;  %vm43_vm1 = vcmask 130048   ;;  %v923_v24 = vmov 683565275  }
  0x14   :  { %887 = vset.pattern.permute.xlu0 %v922_v2  ;;  %v848_v5 = vpack.c.bf16 %v35_v4, %v34_v3  ;;  %v37_v6 = vld [vmem:[%s1063_s2] sm:$0xf]  ;;  %v924_v26 = vmov 2475754826   ;;  %v925_v29 = vmov 2131351028  }
  0x15   :  { %40 = vperm.xlu0 %887, %v37_v6   ;;  %v36_v7 = vld [vmem:[%s1062_s1] sm:$0xf]  ;;  %v926_v32 = vmov 2102212464   ;;  %v927_v35 = vmov 920167782  }
  0x16   :  { %849 = vmatpush3.bf16.msra.mxu0 %v848_v5  ;;  %v412_v8 = vld [vmem:[#allocation2] sm:$0xff]  ;;  %v928_v38 = vmov 1326507024  }
  0x17   :  { %806 = vmatprep.mubr.msk.f32.mxu1 %vm43_vm1, %v412_v8 }
  0x19   :  { %800 = vmatmul.mubr.msk.f32.vlgmr.msra.gmra.mrb[0].mxu0 %vm43_vm1, %v36_v7 }
  0x94   :  { %v41_v9 = vpop.permute.xlu0 %40 }
  0xec   :  { %v113_v10 = vpop.f32.mrb[0].mxu0 }
  0xed   :  { %v114_v11 = vadd.f32 %v113_v10, %v41_v9  ;;  %v801_v12 = vpop.f32.mrb[1].mxu0 }
  0xef   :  { %v988_v13 = vmul.f32 0.5, %v114_v11 }
  0xf1   :  { %v121_v14 = vand.u32 2139095040, %v988_v13  ;;  %v118_v18 = vand.u32 2147483647, %v988_v13  ;;  %vm120_vm9 = vcmp.lt.s32.totalorder %v988_v13, 0 }
  0xf3   :  { %v122_v15 = vshrl.u32 %v121_v14, 23  ;;  %v125_v21 = vand.u32 8388607, %v118_v18  ;;  %vm119_vm10 = vcmp.le.f32.partialorder %v118_v18, 0.7853982 }
  0xf5   :  { %v746_v16 = vadd.s32 4294967169, %v122_v15  ;;  %v126_v40 = vor.u32 8388608, %v125_v21 }
  0xf7   :  { %v128_v17 = vadd.s32 1, %v746_v16  ;;  %v166_v54 = vshll.u32 %v126_v40, 8 }
  0xf9   :  { %vm129_vm2 = vcmp.gt.s32.totalorder %v128_v17, 0 }
  0xfa   :  { %v130_v19 = vsel %vm129_vm2, %v128_v17, 0 }
  0xfb   :  { %v132_v20 = vand.u32 31, %v130_v19  ;;  %v131_v23 = vshrl.u32 %v130_v19, 5 }
  0xfd   :  { %v133_v22 = vsub.s32 32, %v132_v20  ;;  %v135_v25 = vshll.u32 %v923_v24, %v132_v20  ;;  %v138_v27 = vshll.u32 %v924_v26, %v132_v20  ;;  %v141_v31 = vshll.u32 %v925_v29, %v132_v20 }
  0xfe   :  { %v144_v34 = vshll.u32 %v926_v32, %v132_v20  ;;  %v147_v37 = vshll.u32 %v927_v35, %v132_v20  ;;  %vm150_vm3 = vcmp.lt.s32.totalorder %v131_v23, 1  ;;  %vm153_vm4 = vcmp.lt.s32.totalorder %v131_v23, 4 }
  0xff   :  { %v136_v28 = vshrl.u32 %v924_v26, %v133_v22  ;;  %v139_v30 = vshrl.u32 %v925_v29, %v133_v22  ;;  %v142_v33 = vshrl.u32 %v926_v32, %v133_v22  ;;  %v145_v36 = vshrl.u32 %v927_v35, %v133_v22 }
 0x100   :  { %v148_v39 = vshrl.u32 %v928_v38, %v133_v22  ;;  %v134_v49 = vshrl.u32 %v923_v24, %v133_v22  ;;  %vm152_vm5 = vcmp.lt.s32.totalorder %v131_v23, 3  ;;  %vm151_vm6 = vcmp.lt.s32.totalorder %v131_v23, 2 }
 0x101   :  { %v137_v41 = vor.u32 %v136_v28, %v135_v25  ;;  %v140_v42 = vor.u32 %v139_v30, %v138_v27  ;;  %v143_v43 = vor.u32 %v142_v33, %v141_v31  ;;  %v146_v44 = vor.u32 %v145_v36, %v144_v34 }
 0x102   :  { %v149_v45 = vor.u32 %v148_v39, %v147_v37  ;;  %v325_v26 = vlaneseq }
 0x103   :  { %v155_v46 = vsel %vm153_vm4, %v143_v43, 2102212464  ;;  %v158_v47 = vsel %vm150_vm3, %v137_v41, %v140_v42  ;;  %v162_v48 = vsel %vm150_vm3, %v140_v42, %v143_v43  ;;  %v159_v50 = vsel %vm153_vm4, %v146_v44, 920167782 }
 0x104   :  { %v163_v51 = vsel %vm153_vm4, %v149_v45, 1326507024  ;;  %v160_v52 = vsel %vm152_vm5, %v143_v43, %v159_v50  ;;  %v154_v55 = vsel %vm150_vm3, %v134_v49, %v137_v41  ;;  %v156_v56 = vsel %vm152_vm5, %v140_v42, %v155_v46 }
 0x105   :  { %v164_v53 = vsel %vm152_vm5, %v146_v44, %v163_v51  ;;  %v161_v57 = vsel %vm151_vm6, %v158_v47, %v160_v52  ;;  %v157_v63 = vsel %vm151_vm6, %v154_v55, %v156_v56  ;;  %v1004_v31 = vshrl.u32 %v325_v26, 7 }
 0x106   :  { %v165_v58 = vsel %vm151_vm6, %v162_v48, %v164_v53  ;;  %v997_v61 = vmul.u32.u64.low %v166_v54, %v161_v57  ;;  %v998_v62 = vmul.u32.u64.high %v166_v54, %v161_v57, %v997_v61  ;;  %v173_v3 = vmul.u32 %v166_v54, %v157_v63 }
 0x107   :  { %v994_v59 = vmul.u32.u64.low %v166_v54, %v165_v58  ;;  %v995_v60 = vmul.u32.u64.high %v166_v54, %v165_v58, %v994_v59  ;;  %v327_v35 = vadd.s32 8, %v1004_v31  ;;  %v328_v38 = vshra.s32 %v1004_v31, 3 }
 0x108   :  { %v176_v2 = vadd.s32 1, %v998_v62  ;;  %v348_v40 = vshra.s32 %v1004_v31, 2  ;;  %v370_v42 = vshra.s32 %v1004_v31, 1  ;;  %v340_v51 = vsub.s32 0, %v1004_v31 }
 0x109   :  { %vm175_vm7 = vc.u32 %v995_v60, %v997_v61  ;;  %v174_v16 = vadd.s32 %v997_v61, %v995_v60  ;;  %v329_v39 = vshra.s32 %v327_v35, 3  ;;  %v349_v41 = vshra.s32 %v327_v35, 2 }
 0x10a   :  { %v177_v4 = vsel %vm175_vm7, %v176_v2, %v998_v62  ;;  %v371_v44 = vshra.s32 %v327_v35, 1  ;;  %v330_v18 = vand.u32 1, %v328_v38  ;;  %v350_v46 = vand.u32 1, %v348_v40 }
 0x10b   :  { %v178_v5 = vadd.s32 %v177_v4, %v173_v3  ;;  %v331_v45 = vand.u32 1, %v329_v39  ;;  %v351_v47 = vand.u32 1, %v349_v41  ;;  %v372_v48 = vand.u32 1, %v370_v42 }
 0x10c   :  { %v360_v52 = vsub.s32 1, %v1004_v31  ;;  %v373_v53 = vand.u32 1, %v371_v44  ;;  %v382_v54 = vsub.s32 2, %v1004_v31  ;;  %vm332_vm11 = vcmp.eq.s32.totalorder %v330_v18, 1 }
 0x10d   :  { %v179_v6 = vadd.s32 536870912, %v178_v5  ;;  %vm333_vm12 = vcmp.eq.s32.totalorder %v331_v45, 1  ;;  %vm352_vm13 = vcmp.eq.s32.totalorder %v350_v46, 1  ;;  %v392_v56 = vand.u32 1, %v1004_v31 }
 0x10e   :  { %vm353_vm14 = vcmp.eq.s32.totalorder %v351_v47, 1  ;;  %vm374_vm15 = vcmp.eq.s32.totalorder %v372_v48, 1  ;;  %v393_v59 = vand.u32 1, %v327_v35  ;;  %v402_v61 = vsub.s32 3, %v1004_v31  ;;  %v414_v35 = vld [vmem:[#allocation2 + $0x10] sm:$0xff]  ;;  %v417_v48 = vld [vmem:[#allocation2 + $0x28] sm:$0xff] }
 0x10f   :  { %v180_v7 = vshrl.u32 %v179_v6, 30 }
 0x110   :  { %vm1024_vm0 = vcmp.eq.s32.totalorder %v393_v59, 1 }
 0x111   :  { %v181_v8 = vshll.u32 %v180_v7, 30  ;;  %v204_v30 = vsub.s32 4, %v180_v7 }
 0x113   :  { %v182_v9 = vsub.s32 %v178_v5, %v181_v8  ;;  %v205_v34 = vsel %vm120_vm9, %v204_v30, %v180_v7 }
 0x114   :  { %v207_v37 = vsel %vm119_vm10, 0, %v205_v34  ;;  %v413_v34 = vld [vmem:[#allocation2 + $0x8] sm:$0xff] }
 0x115   :  { %v184_v10 = vsub.s32 0, %v182_v9  ;;  %v314_v43 = vadd.s32 3, %v207_v37  ;;  %v211_v49 = vand.u32 3, %v207_v37  ;;  %v416_v37 = vld [vmem:[#allocation2 + $0x20] sm:$0xff] }
 0x116   :  { %816 = vmatprep.mubr.msk.f32.mxu0 %vm43_vm1, %v416_v37 }
 0x117   :  { %v747_v11 = vmin.u32 %v184_v10, %v182_v9  ;;  %v315_v50 = vand.u32 3, %v314_v43  ;;  %vm216_vm2 = vcmp.eq.s32.totalorder %v211_v49, 2  ;;  %vm213_vm4 = vcmp.eq.s32.totalorder %v211_v49, 0 }
 0x118   :  { %vm212_vm6 = vcmp.lt.s32.totalorder %v211_v49, 2  ;;  %v418_v49 = vld [vmem:[#allocation2 + $0x30] sm:$0xff] }
 0x119   :  { %v186_v12 = vclz %v747_v11  ;;  %vm320_vm3 = vcmp.eq.s32.totalorder %v315_v50, 2  ;;  %vm317_vm5 = vcmp.eq.s32.totalorder %v315_v50, 0  ;;  %vm316_vm7 = vcmp.lt.s32.totalorder %v315_v50, 2  ;;  %v420_v50 = vld [vmem:[#allocation2 + $0x40] sm:$0xff] }
 0x11b   :  { %v748_v14 = vadd.s32 4294967294, %v186_v12 }
 0x11d   :  { %vm749_vm8 = vcmp.lt.s32.totalorder %v748_v14, 0 }
 0x11e   :  { %v189_v15 = vsel %vm749_vm8, 0, %v748_v14  ;;  %vm210_vm8 = vweird.f32 %v988_v13 }
 0x11f   :  { %v190_v17 = vsub.s32 32, %v189_v15  ;;  %v194_v19 = vsub.s32 4294967266, %v189_v15  ;;  %v191_v20 = vshll.u32 %v182_v9, %v189_v15 }
 0x121   :  { %v192_v21 = vshrl.u32 %v174_v16, %v190_v17  ;;  %v195_v22 = vadd.s32 127, %v194_v19 }
 0x123   :  { %v193_v23 = vor.u32 %v192_v21, %v191_v20  ;;  %v196_v24 = vshll.u32 %v195_v22, 23 }
 0x125   :  { %v197_v25 = vor.u32 4788187, %v196_v24  ;;  %v200_v28 = vcvt.s32.f32 %v193_v23 }
 0x127   :  { %v198_v27 = vand.u32 2147483647, %v197_v25 }
 0x129   :  { %v201_v29 = vmul.f32 %v200_v28, %v198_v27 }
 0x12b   :  { %v202_v32 = vxor.u32 2147483648, %v201_v29 }
 0x12d   :  { %v203_v33 = vsel %vm120_vm9, %v202_v32, %v201_v29  ;;  %vm375_vm9 = vcmp.eq.s32.totalorder %v373_v53, 1  ;;  %v423_v53 = vld [vmem:[#allocation2 + $0x58] sm:$0xff] }
 0x12e   :  { %v206_v36 = vsel %vm119_vm10, %v988_v13, %v203_v33  ;;  %vm1020_vm10 = vcmp.eq.s32.totalorder %v392_v56, 1 }
 0x12f   :  { %888 = vcosq.f32 %v206_v36 }
 0x130   :  { %890 = vsinq.f32 %v206_v36  ;;  %v415_v36 = vld [vmem:[#allocation2 + $0x18] sm:$0xff] }
 0x139   :  { %v889_v55 = vpop.eup %888 }
 0x13a   :  { %v891_v57 = vpop.eup %890  ;;  %v217_v58 = vxor.u32 2147483648, %v889_v55 }
 0x13b   :  { %v214_v60 = vxor.u32 2147483648, %v891_v57 }
 0x13c   :  { %v218_v62 = vsel %vm216_vm2, %v217_v58, %v891_v57  ;;  %v322_v63 = vsel %vm320_vm3, %v217_v58, %v891_v57 }
 0x13d   :  { %v215_v2 = vsel %vm213_vm4, %v889_v55, %v214_v60  ;;  %v319_v3 = vsel %vm317_vm5, %v889_v55, %v214_v60 }
 0x13e   :  { %v219_v4 = vsel %vm212_vm6, %v215_v2, %v218_v62  ;;  %v323_v5 = vsel %vm316_vm7, %v319_v3, %v322_v63 }
 0x13f   :  { %v220_v6 = vsel %vm210_vm8, nan, %v219_v4  ;;  %v324_v7 = vsel %vm210_vm8, nan, %v323_v5 }
 0x140   :  { %v341_v10 = vrot.slane %v324_v7, %v340_v51  ;;  %v345_v11 = vrot.slane %v220_v6, %v340_v51  ;;  %v361_v12 = vrot.slane %v324_v7, %v360_v52  ;;  %v365_v14 = vrot.slane %v220_v6, %v360_v52  ;;  %v421_v51 = vld [vmem:[#allocation2 + $0x48] sm:$0xff]  ;;  %v422_v52 = vld [vmem:[#allocation2 + $0x50] sm:$0xff] }
 0x141   :  { %v383_v15 = vrot.slane %v324_v7, %v382_v54  ;;  %v387_v16 = vrot.slane %v220_v6, %v382_v54  ;;  %v403_v13 = vrot.slane %v324_v7, %v402_v61  ;;  %v407_v17 = vrot.slane %v220_v6, %v402_v61 }
 0x142   :  { %v346_v19 = vsel %vm332_vm11, %v341_v10, %v345_v11  ;;  %v347_v20 = vsel %vm333_vm12, %v341_v10, %v345_v11  ;;  %v366_v21 = vsel %vm352_vm13, %v361_v12, %v365_v14  ;;  %v367_v22 = vsel %vm353_vm14, %v361_v12, %v365_v14  ;;  %v664_v12 = vld [vmem:[%s1065_s4] sm:$0x1] }
 0x143   :  { %v368_v23 = vmul.f32 %v366_v21, %v346_v19  ;;  %v369_v24 = vmul.f32 %v367_v22, %v347_v20  ;;  %v388_v25 = vsel %vm374_vm15, %v383_v15, %v387_v16  ;;  %v389_v26 = vsel %vm375_vm9, %v383_v15, %v387_v16 }
 0x144   :  { %v408_v27 = vsel %vm1020_vm10, %v403_v13, %v407_v17  ;;  %v409_v28 = vsel %vm1024_vm0, %v403_v13, %v407_v17  ;;  %vm1072_vm0 = vmmov 0  }
 0x145   :  { %v390_v29 = vmul.f32 %v388_v25, %v368_v23  ;;  %v391_v30 = vmul.f32 %v389_v26, %v369_v24 }
 0x147   :  { %v410_v31 = vmul.f32 %v408_v27, %v390_v29  ;;  %v411_v32 = vmul.f32 %v409_v28, %v391_v30 }
 0x149   :  { %v850_v33 = vpack.c.bf16 %v411_v32, %v410_v31 }
 0x14b   :  { %851 = vmatprep.subr.bf16.mxu1 %v850_v33 }
 0x14c   :  { %853 = vmatpush3.bf16.msra.mxu1 %v850_v33 }
 0x14d   :  { %858 = vmatprep.subr.bf16.mxu1 %v919_v0 }
 0x14f   :  { %807 = vmatmul.mubr.msk.f32.vlgmr.msra.gmra.mrb[0].mxu1 %vm43_vm1, %v413_v34 }
 0x150   :  { %809 = vmatprep.mubr.msk.f32.mxu1 %vm43_vm1, %v414_v35 }
 0x153   :  { %810 = vmatmul.mubr.msk.f32.gmra.mrb[2].mxu1 %vm43_vm1, %v415_v36 }
 0x154   :  { %844 = vmatprep.mubr.msk.f32.mxu1 %vm1072_vm0, %v921_v1  ;;  %v419_v1 = vld [vmem:[#allocation2 + $0x38] sm:$0xff] }
 0x222   :  { %v808_v38 = vpop.f32.mrb[0].mxu1 }
 0x223   :  { %v502_v39 = vpop.f32.mrb[1].mxu1  ;;  %v522_v41 = vmul.f32 %v808_v38, %v808_v38 }
 0x224   :  { %v521_v44 = vmul.f32 %v502_v39, %v502_v39 }
 0x226   :  { %v811_v40 = vpop.f32.mrb[2].mxu1 }
 0x227   :  { %v524_v42 = vmul.f32 %v811_v40, %v811_v40  ;;  %v512_v43 = vpop.f32.mrb[3].mxu1 }
 0x228   :  { %v523_v18 = vmul.f32 %v512_v43, %v512_v43 }
 0x229   :  { %v526_v45 = vadd.f32 %v524_v42, %v522_v41 }
 0x22a   :  { %v525_v46 = vadd.f32 %v523_v18, %v521_v44 }
 0x22c   :  { %v854_v47 = vpack.c.bf16 %v526_v45, %v525_v46 }
 0x22e   :  { %855 = vmatprep.subr.bf16.mxu0 %v854_v47 }
 0x22f   :  { %857 = vmatpush3.bf16.msra.mxu0 %v854_v47 }
 0x232   :  { %817 = vmatmul.mubr.msk.f32.vlgmr.msra.gmra.mrb[2].mxu0 %vm43_vm1, %v417_v48 }
 0x233   :  { %819 = vmatprep.mubr.msk.f32.mxu0 %vm43_vm1, %v418_v49 }
 0x236   :  { %820 = vmatmul.mubr.msk.f32.gmra.mrb[4].mxu0 %vm43_vm1, %v419_v1 }
 0x237   :  { %822 = vmatprep.mubr.msk.f32.mxu0 %vm43_vm1, %v420_v50 }
 0x23a   :  { %823 = vmatmul.mubr.msk.f32.gmra.mrb[6].mxu0 %vm43_vm1, %v421_v51 }
 0x23b   :  { %825 = vmatprep.mubr.msk.f32.mxu0 %vm43_vm1, %v422_v52 }
 0x23e   :  { %826 = vmatmul.mubr.msk.f32.gmra.mrb[8].mxu0 %vm43_vm1, %v423_v53  ;;  %vm665_vm1 = vcmask 523264  }
 0x305   :  { %v818_v54 = vpop.f32.mrb[2].mxu0 }
 0x306   :  { %v657_v55 = vmax.f32 %v818_v54, 0.0  ;;  %v617_v56 = vpop.f32.mrb[3].mxu0 }
 0x307   :  { %v656_v57 = vmax.f32 %v617_v56, 0.0 }
 0x309   :  { %v859_v58 = vpack.c.bf16 %v657_v55, %v656_v57  ;;  %v821_v59 = vpop.f32.mrb[4].mxu0 }
 0x30a   :  { %v659_v60 = vmax.f32 %v821_v59, 0.0  ;;  %v627_v61 = vpop.f32.mrb[5].mxu0 }
 0x30b   :  { %v658_v62 = vmax.f32 %v627_v61, 0.0  ;;  %860 = vmatpush3.bf16.msra.mxu1 %v859_v58 }
 0x30c   :  { %861 = vmatprep.subr.bf16.mxu1 %v919_v0 }
 0x30d   :  { %v862_v63 = vpack.c.bf16 %v659_v60, %v658_v62  ;;  %v824_v2 = vpop.f32.mrb[6].mxu0 }
 0x30e   :  { %v661_v3 = vmax.f32 %v824_v2, 0.0  ;;  %v637_v4 = vpop.f32.mrb[7].mxu0 }
 0x30f   :  { %v660_v5 = vmax.f32 %v637_v4, 0.0  ;;  %863 = vmatpush3.bf16.msra.mxu1 %v862_v63 }
 0x310   :  { %864 = vmatprep.subr.bf16.mxu1 %v919_v0 }
 0x311   :  { %v865_v6 = vpack.c.bf16 %v661_v3, %v660_v5  ;;  %v827_v7 = vpop.f32.mrb[8].mxu0 }
 0x312   :  { %v663_v8 = vmax.f32 %v827_v7, 0.0  ;;  %v647_v9 = vpop.f32.mrb[9].mxu0 }
 0x313   :  { %v662_v10 = vmax.f32 %v647_v9, 0.0  ;;  %866 = vmatpush3.bf16.msra.mxu1 %v865_v6 }
 0x314   :  { %867 = vmatprep.subr.bf16.mxu1 %v919_v0 }
 0x315   :  { %v868_v11 = vpack.c.bf16 %v663_v8, %v662_v10 }
 0x317   :  { %869 = vmatpush3.bf16.msra.mxu1 %v868_v11 }
 0x31a   :  { %845 = vmatmul.mubr.msk.f32.vlgmr.msra.gmra.mrb[4].mxu1 %vm665_vm1, %v664_v12 }
 0x3ed   :  { %v735_v14 = vpop.f32.mrb[4].mxu1 }
 0x3ee   :  { %739 = vst [vmem:[%s1066_s5] sm:$0x1] %v735_v14  ;;  %v846_v15 = vpop.f32.mrb[5].mxu1 }
 0x3ef   :  { %744 = vsyncpa [#allocation3], 1 }

</bundles_post_ra>
